<compile_context>
chip_gen: v5e
topology: v5e:2x2
jax: 0.10.0
libtpu: 0.0.40
codegen_flags: <defaults>
</compile_context>

<pallas_src>
import functools
import math

import jax
import jax.numpy as jnp
from jax.experimental import pallas as pl
from jax.experimental.pallas import tpu as pltpu


def _round_up(x, m):
    return ((x + m - 1) // m) * m


# ---------------------------------------------------------------------------
# Pallas kernel: fused (concat + 3-layer MLP)
# ---------------------------------------------------------------------------
def _mlp_kernel(*refs, num_features):
    feat_refs = refs[:num_features]
    w1_refs = refs[num_features:2 * num_features]
    b1_ref, w2_ref, b2_ref, w3_ref, b3_ref, o_ref = refs[2 * num_features:]

    # Layer 1: concat fused as a sum of partial matmuls against W1 row-slices.
    # bf16 inputs -> MXU, f32 accumulation.
    h1 = b1_ref[...]  # [1, 128] f32, broadcasts over the batch tile
    for f_ref, w_ref in zip(feat_refs, w1_refs):
        h1 = h1 + jnp.dot(f_ref[...], w_ref[...],
                          preferred_element_type=jnp.float32)
    h1 = jnp.maximum(h1, 0.0)            # ReLU (Dropout = identity, eval mode)

    # Layer 2: Linear(128, 64) + ReLU
    h2 = jnp.dot(h1.astype(w2_ref.dtype), w2_ref[...],
                 preferred_element_type=jnp.float32) + b2_ref[...]
    h2 = jnp.maximum(h2, 0.0)            # ReLU (Dropout = identity, eval mode)

    # Layer 3: Linear(64, output_dim)
    out = jnp.dot(h2.astype(w3_ref.dtype), w3_ref[...],
                  preferred_element_type=jnp.float32) + b3_ref[...]
    # NOTE: out_dim (=8) < 128 lanes -> masked stores; amortized by large tiles.
    o_ref[...] = out.astype(o_ref.dtype)


# ---------------------------------------------------------------------------
# Wrapper: batch-tiled pallas_call with VMEM-resident weights
# ---------------------------------------------------------------------------
def backbone_mlp_pallas(features, params, compute_dtype=jnp.bfloat16,
                        tile_b=None):
    """features: list of [B, f_i] arrays. params: dict of w1,b1,w2,b2,w3,b3.

    Weights are stored [in_features, out_features] (transposed vs. PyTorch
    nn.Linear) so the kernel computes y = x @ W + b on the MXU. Biases are
    [1, F] rows.
    """
    B = features[0].shape[0]
    widths = [int(f.shape[1]) for f in features]
    in_dim = sum(widths)
    assert params["w1"].shape[0] == in_dim, (params["w1"].shape, in_dim)
    hidden1 = params["w1"].shape[1]
    hidden2 = params["w2"].shape[1]
    out_dim = params["w3"].shape[1]

    # --- batch tiling -------------------------------------------------------
    # 1024 rows: multiple of 256 (v6e/v7x MXU edge) and 128 (v5e), multiple of
    # 16 for bf16 sublane packing; footprint stays far below scoped VMEM.
    TARGET_TILE = 1024
    if tile_b is None:
        tile_b = TARGET_TILE if B >= TARGET_TILE else max(16, _round_up(B, 16))
    assert tile_b % 16 == 0
    B_pad = _round_up(B, tile_b)
    num_tiles = B_pad // tile_b

    # --- pad + cast inputs; split w1 by feature widths ----------------------
    feats = []
    for f in features:
        f = f.astype(compute_dtype)
        if B_pad != B:
            f = jnp.pad(f, ((0, B_pad - B), (0, 0)))
        feats.append(f)

    w1 = params["w1"].astype(compute_dtype)
    offs = [0]
    for w in widths:
        offs.append(offs[-1] + w)
    w1_parts = [w1[offs[i]:offs[i + 1], :] for i in range(len(widths))]
    w2 = params["w2"].astype(compute_dtype)
    w3 = params["w3"].astype(compute_dtype)
    b1 = params["b1"].astype(jnp.float32)
    b2 = params["b2"].astype(jnp.float32)
    b3 = params["b3"].astype(jnp.float32)

    # --- BlockSpecs ---------------------------------------------------------
    batch_map = lambda i: (i, 0)
    const_map = lambda i: (0, 0)
    feat_specs = [pl.BlockSpec((tile_b, w), batch_map) for w in widths]
    w1_specs = [pl.BlockSpec(p.shape, const_map) for p in w1_parts]
    tail_specs = [
        pl.BlockSpec(b1.shape, const_map),
        pl.BlockSpec(w2.shape, const_map),
        pl.BlockSpec(b2.shape, const_map),
        pl.BlockSpec(w3.shape, const_map),
        pl.BlockSpec(b3.shape, const_map),
    ]
    out_spec = pl.BlockSpec((tile_b, out_dim), batch_map)

    itemsize = jnp.dtype(compute_dtype).itemsize
    flops = 2 * B_pad * (in_dim * hidden1 + hidden1 * hidden2 + hidden2 * out_dim)
    bytes_accessed = (
        B_pad * in_dim * itemsize                     # inputs
        + B_pad * out_dim * 4                         # output (f32)
        + (in_dim * hidden1 + hidden1 * hidden2 + hidden2 * out_dim) * itemsize
        + (hidden1 + hidden2 + out_dim) * 4           # biases
    )

    kernel = functools.partial(_mlp_kernel, num_features=len(features))

    out_pad = pl.pallas_call(
        kernel,
        out_shape=jax.ShapeDtypeStruct((B_pad, out_dim), jnp.float32),
        grid=(num_tiles,),
        in_specs=feat_specs + w1_specs + tail_specs,
        out_specs=out_spec,
        compiler_params=pltpu.CompilerParams(
            dimension_semantics=("parallel",),      # megacore on v7x
            vmem_limit_bytes=32 * 1024 * 1024,      # safe on v5e/v6e/v7x
        ),
        cost_estimate=pl.CostEstimate(
            flops=flops, transcendentals=0, bytes_accessed=bytes_accessed),
    )(*feats, *w1_parts, b1, w2, b2, w3, b3)

    return out_pad[:B]


# ---------------------------------------------------------------------------
# Parameter init (PyTorch nn.Linear-style uniform(-1/sqrt(fan_in)))
# ---------------------------------------------------------------------------
def init_params(key, input_dim, output_dim):
    dims = [(input_dim, 128), (128, 64), (64, output_dim)]
    params = {}
    keys = jax.random.split(key, 2 * len(dims))
    for i, (fan_in, fan_out) in enumerate(dims):
        bound = 1.0 / math.sqrt(fan_in)
        w = jax.random.uniform(keys[2 * i], (fan_in, fan_out), jnp.float32,
                               minval=-bound, maxval=bound)
        b = jax.random.uniform(keys[2 * i + 1], (1, fan_out), jnp.float32,
                               minval=-bound, maxval=bound)
        params[f"w{i + 1}"] = w
        params[f"b{i + 1}"] = b
    return params


# ---------------------------------------------------------------------------
# Forward pass: defaults resolved in plain JAX, MLP (with fused concat) in Pallas
# ---------------------------------------------------------------------------
def backbone_forward(state_dict, params, compute_dtype=jnp.bfloat16,
                     tile_b=None):
    location = state_dict["location"]
    status = state_dict["status"]
    rays = state_dict["rays"]
    relative_pos = state_dict.get("relative_pos", jnp.zeros_like(location))
    time_features = state_dict.get(
        "time_features", jnp.zeros((location.shape[0], 2), dtype=location.dtype))
    features = [location, status, rays, relative_pos, time_features]
    return backbone_mlp_pallas(features, params, compute_dtype, tile_b)


# ---------------------------------------------------------------------------
# Pure-JAX references for sanity checks
# ---------------------------------------------------------------------------
def _reference_f32(features, params):
    x = jnp.concatenate(features, axis=1)
    h1 = jnp.maximum(x @ params["w1"] + params["b1"], 0.0)
    h2 = jnp.maximum(h1 @ params["w2"] + params["b2"], 0.0)
    return h2 @ params["w3"] + params["b3"]


def _reference_bf16(features, params, compute_dtype=jnp.bfloat16):
    x = jnp.concatenate([f.astype(compute_dtype) for f in features], axis=1)
    w1 = params["w1"].astype(compute_dtype)
    w2 = params["w2"].astype(compute_dtype)
    w3 = params["w3"].astype(compute_dtype)
    h1 = jnp.maximum(
        jnp.dot(x, w1, preferred_element_type=jnp.float32) + params["b1"], 0.0)
    h2 = jnp.maximum(
        jnp.dot(h1.astype(compute_dtype), w2,
                preferred_element_type=jnp.float32) + params["b2"], 0.0)
    return jnp.dot(h2.astype(compute_dtype), w3,
                   preferred_element_type=jnp.float32) + params["b3"]


if __name__ == "__main__":
    key = jax.random.PRNGKey(0)
    k_loc, k_sta, k_ray, k_rel, k_tim, k_par = jax.random.split(key, 6)

    B = 2
    # feature widths: location=2, status=4, rays=8, relative_pos=2, time=2 -> 18
    location = jax.random.normal(k_loc, (B, 2), jnp.float32)
    status = jax.random.normal(k_sta, (B, 4), jnp.float32)
    rays = jax.random.normal(k_ray, (B, 8), jnp.float32)
    relative_pos = jax.random.normal(k_rel, (B, 2), jnp.float32)
    time_features = jax.random.normal(k_tim, (B, 2), jnp.float32)

    input_dim = 2 + 4 + 8 + 2 + 2   # 18
    output_dim = 8
    params = init_params(k_par, input_dim, output_dim)

    state_dict = {
        "location": location,
        "status": status,
        "rays": rays,
        "relative_pos": relative_pos,
        "time_features": time_features,
    }
    features = [location, status, rays, relative_pos, time_features]

    out = jax.block_until_ready(backbone_forward(state_dict, params))
    assert out.shape == (B, output_dim)

    ref_bf16 = jax.block_until_ready(_reference_bf16(features, params))
    ref_f32 = jax.block_until_ready(_reference_f32(features, params))
    assert jnp.allclose(out, ref_bf16, atol=5e-3, rtol=5e-3)
    assert jnp.allclose(out, ref_f32, atol=1e-1, rtol=1e-1)

    # Second check: non-aligned batch with a small tile override so the grid
    # actually pipelines multiple batch tiles (exercises padding + slicing).
    B2 = 40
    k2 = jax.random.split(jax.random.PRNGKey(1), 5)
    feats2 = [
        jax.random.normal(k2[0], (B2, 2), jnp.float32),
        jax.random.normal(k2[1], (B2, 4), jnp.float32),
        jax.random.normal(k2[2], (B2, 8), jnp.float32),
        jax.random.normal(k2[3], (B2, 2), jnp.float32),
        jax.random.normal(k2[4], (B2, 2), jnp.float32),
    ]
    out2 = jax.block_until_ready(
        backbone_mlp_pallas(feats2, params, tile_b=16))
    ref2 = jax.block_until_ready(_reference_bf16(feats2, params))
    assert out2.shape == (B2, output_dim)
    assert jnp.allclose(out2, ref2, atol=5e-3, rtol=5e-3)

    print("KERNEL_OK")
</pallas_src>

<mosaic_0001>
module attributes {stable_mosaic.version = 11 : i64} {
  func.func @_mlp_kernel(%arg0: i32, %arg1: memref<16x2xbf16, #tpu.memory_space<vmem>>, %arg2: memref<16x4xbf16, #tpu.memory_space<vmem>>, %arg3: memref<16x8xbf16, #tpu.memory_space<vmem>>, %arg4: memref<16x2xbf16, #tpu.memory_space<vmem>>, %arg5: memref<16x2xbf16, #tpu.memory_space<vmem>>, %arg6: memref<2x128xbf16, #tpu.memory_space<vmem>>, %arg7: memref<4x128xbf16, #tpu.memory_space<vmem>>, %arg8: memref<8x128xbf16, #tpu.memory_space<vmem>>, %arg9: memref<2x128xbf16, #tpu.memory_space<vmem>>, %arg10: memref<2x128xbf16, #tpu.memory_space<vmem>>, %arg11: memref<1x128xf32, #tpu.memory_space<vmem>>, %arg12: memref<128x64xbf16, #tpu.memory_space<vmem>>, %arg13: memref<1x64xf32, #tpu.memory_space<vmem>>, %arg14: memref<64x8xbf16, #tpu.memory_space<vmem>>, %arg15: memref<1x8xf32, #tpu.memory_space<vmem>>, %arg16: memref<16x8xf32, #tpu.memory_space<vmem>>) attributes {dimension_semantics = [#tpu.dimension_semantics<parallel>], iteration_bounds = array<i64: 1>, scalar_prefetch = 0 : i64, scratch_operands = 0 : i64, tpu.core_type = #tpu.core_type<tc>, window_params = [{transform_indices = @transform_0, window_bounds = array<i64: 16, 2>}, {transform_indices = @transform_1, window_bounds = array<i64: 16, 4>}, {transform_indices = @transform_2, window_bounds = array<i64: 16, 8>}, {transform_indices = @transform_3, window_bounds = array<i64: 16, 2>}, {transform_indices = @transform_4, window_bounds = array<i64: 16, 2>}, {pipeline_mode = #tpu.pipeline_mode<synchronous>, transform_indices = @transform_5, window_bounds = array<i64: 2, 128>}, {pipeline_mode = #tpu.pipeline_mode<synchronous>, transform_indices = @transform_6, window_bounds = array<i64: 4, 128>}, {pipeline_mode = #tpu.pipeline_mode<synchronous>, transform_indices = @transform_7, window_bounds = array<i64: 8, 128>}, {pipeline_mode = #tpu.pipeline_mode<synchronous>, transform_indices = @transform_8, window_bounds = array<i64: 2, 128>}, {pipeline_mode = #tpu.pipeline_mode<synchronous>, transform_indices = @transform_9, window_bounds = array<i64: 2, 128>}, {pipeline_mode = #tpu.pipeline_mode<synchronous>, transform_indices = @transform_10, window_bounds = array<i64: 1, 128>}, {pipeline_mode = #tpu.pipeline_mode<synchronous>, transform_indices = @transform_11, window_bounds = array<i64: 128, 64>}, {pipeline_mode = #tpu.pipeline_mode<synchronous>, transform_indices = @transform_12, window_bounds = array<i64: 1, 64>}, {pipeline_mode = #tpu.pipeline_mode<synchronous>, transform_indices = @transform_13, window_bounds = array<i64: 64, 8>}, {pipeline_mode = #tpu.pipeline_mode<synchronous>, transform_indices = @transform_14, window_bounds = array<i64: 1, 8>}, {transform_indices = @transform_15, window_bounds = array<i64: 16, 8>}]} {
    %c0 = arith.constant 0 : index
    %c0_0 = arith.constant 0 : index
    %0 = vector.load %arg11[%c0, %c0_0] : memref<1x128xf32, #tpu.memory_space<vmem>>, vector<1x128xf32>
    %c0_1 = arith.constant 0 : index
    %c0_2 = arith.constant 0 : index
    %1 = vector.load %arg1[%c0_1, %c0_2] : memref<16x2xbf16, #tpu.memory_space<vmem>>, vector<16x2xbf16>
    %c0_3 = arith.constant 0 : index
    %c0_4 = arith.constant 0 : index
    %2 = vector.load %arg6[%c0_3, %c0_4] : memref<2x128xbf16, #tpu.memory_space<vmem>>, vector<2x128xbf16>
    %cst = arith.constant dense<0.000000e+00> : vector<16x128xf32>
    %3 = tpu.matmul %1, %2, %cst {dimension_numbers = #tpu.dot_dimension_numbers<[1], [0], [0], [1], [0, 0, 1, 1], [], []>} : vector<16x2xbf16>, vector<2x128xbf16>, vector<16x128xf32> -> vector<16x128xf32>
    %4 = vector.broadcast %0 : vector<1x128xf32> to vector<16x128xf32>
    %5 = arith.addf %4, %3 : vector<16x128xf32>
    %c0_5 = arith.constant 0 : index
    %c0_6 = arith.constant 0 : index
    %6 = vector.load %arg2[%c0_5, %c0_6] : memref<16x4xbf16, #tpu.memory_space<vmem>>, vector<16x4xbf16>
    %c0_7 = arith.constant 0 : index
    %c0_8 = arith.constant 0 : index
    %7 = vector.load %arg7[%c0_7, %c0_8] : memref<4x128xbf16, #tpu.memory_space<vmem>>, vector<4x128xbf16>
    %cst_9 = arith.constant dense<0.000000e+00> : vector<16x128xf32>
    %8 = tpu.matmul %6, %7, %cst_9 {dimension_numbers = #tpu.dot_dimension_numbers<[1], [0], [0], [1], [0, 0, 1, 1], [], []>} : vector<16x4xbf16>, vector<4x128xbf16>, vector<16x128xf32> -> vector<16x128xf32>
    %9 = arith.addf %5, %8 : vector<16x128xf32>
    %c0_10 = arith.constant 0 : index
    %c0_11 = arith.constant 0 : index
    %10 = vector.load %arg3[%c0_10, %c0_11] : memref<16x8xbf16, #tpu.memory_space<vmem>>, vector<16x8xbf16>
    %c0_12 = arith.constant 0 : index
    %c0_13 = arith.constant 0 : index
    %11 = vector.load %arg8[%c0_12, %c0_13] : memref<8x128xbf16, #tpu.memory_space<vmem>>, vector<8x128xbf16>
    %cst_14 = arith.constant dense<0.000000e+00> : vector<16x128xf32>
    %12 = tpu.matmul %10, %11, %cst_14 {dimension_numbers = #tpu.dot_dimension_numbers<[1], [0], [0], [1], [0, 0, 1, 1], [], []>} : vector<16x8xbf16>, vector<8x128xbf16>, vector<16x128xf32> -> vector<16x128xf32>
    %13 = arith.addf %9, %12 : vector<16x128xf32>
    %c0_15 = arith.constant 0 : index
    %c0_16 = arith.constant 0 : index
    %14 = vector.load %arg4[%c0_15, %c0_16] : memref<16x2xbf16, #tpu.memory_space<vmem>>, vector<16x2xbf16>
    %c0_17 = arith.constant 0 : index
    %c0_18 = arith.constant 0 : index
    %15 = vector.load %arg9[%c0_17, %c0_18] : memref<2x128xbf16, #tpu.memory_space<vmem>>, vector<2x128xbf16>
    %cst_19 = arith.constant dense<0.000000e+00> : vector<16x128xf32>
    %16 = tpu.matmul %14, %15, %cst_19 {dimension_numbers = #tpu.dot_dimension_numbers<[1], [0], [0], [1], [0, 0, 1, 1], [], []>} : vector<16x2xbf16>, vector<2x128xbf16>, vector<16x128xf32> -> vector<16x128xf32>
    %17 = arith.addf %13, %16 : vector<16x128xf32>
    %c0_20 = arith.constant 0 : index
    %c0_21 = arith.constant 0 : index
    %18 = vector.load %arg5[%c0_20, %c0_21] : memref<16x2xbf16, #tpu.memory_space<vmem>>, vector<16x2xbf16>
    %c0_22 = arith.constant 0 : index
    %c0_23 = arith.constant 0 : index
    %19 = vector.load %arg10[%c0_22, %c0_23] : memref<2x128xbf16, #tpu.memory_space<vmem>>, vector<2x128xbf16>
    %cst_24 = arith.constant dense<0.000000e+00> : vector<16x128xf32>
    %20 = tpu.matmul %18, %19, %cst_24 {dimension_numbers = #tpu.dot_dimension_numbers<[1], [0], [0], [1], [0, 0, 1, 1], [], []>} : vector<16x2xbf16>, vector<2x128xbf16>, vector<16x128xf32> -> vector<16x128xf32>
    %21 = arith.addf %17, %20 : vector<16x128xf32>
    %cst_25 = arith.constant 0.000000e+00 : f32
    %22 = vector.broadcast %cst_25 : f32 to vector<16x128xf32>
    %23 = arith.maximumf %21, %22 : vector<16x128xf32>
    %24 = arith.truncf %23 : vector<16x128xf32> to vector<16x128xbf16>
    %c0_26 = arith.constant 0 : index
    %c0_27 = arith.constant 0 : index
    %25 = vector.load %arg12[%c0_26, %c0_27] : memref<128x64xbf16, #tpu.memory_space<vmem>>, vector<128x64xbf16>
    %cst_28 = arith.constant dense<0.000000e+00> : vector<16x64xf32>
    %26 = tpu.matmul %24, %25, %cst_28 {dimension_numbers = #tpu.dot_dimension_numbers<[1], [0], [0], [1], [0, 0, 1, 1], [], []>} : vector<16x128xbf16>, vector<128x64xbf16>, vector<16x64xf32> -> vector<16x64xf32>
    %c0_29 = arith.constant 0 : index
    %c0_30 = arith.constant 0 : index
    %27 = vector.load %arg13[%c0_29, %c0_30] : memref<1x64xf32, #tpu.memory_space<vmem>>, vector<1x64xf32>
    %28 = vector.broadcast %27 : vector<1x64xf32> to vector<16x64xf32>
    %29 = arith.addf %26, %28 : vector<16x64xf32>
    %cst_31 = arith.constant 0.000000e+00 : f32
    %30 = vector.broadcast %cst_31 : f32 to vector<16x64xf32>
    %31 = arith.maximumf %29, %30 : vector<16x64xf32>
    %32 = arith.truncf %31 : vector<16x64xf32> to vector<16x64xbf16>
    %c0_32 = arith.constant 0 : index
    %c0_33 = arith.constant 0 : index
    %33 = vector.load %arg14[%c0_32, %c0_33] : memref<64x8xbf16, #tpu.memory_space<vmem>>, vector<64x8xbf16>
    %cst_34 = arith.constant dense<0.000000e+00> : vector<16x8xf32>
    %34 = tpu.matmul %32, %33, %cst_34 {dimension_numbers = #tpu.dot_dimension_numbers<[1], [0], [0], [1], [0, 0, 1, 1], [], []>} : vector<16x64xbf16>, vector<64x8xbf16>, vector<16x8xf32> -> vector<16x8xf32>
    %c0_35 = arith.constant 0 : index
    %c0_36 = arith.constant 0 : index
    %35 = vector.load %arg15[%c0_35, %c0_36] : memref<1x8xf32, #tpu.memory_space<vmem>>, vector<1x8xf32>
    %36 = vector.broadcast %35 : vector<1x8xf32> to vector<16x8xf32>
    %37 = arith.addf %34, %36 : vector<16x8xf32>
    %c0_37 = arith.constant 0 : index
    %c0_38 = arith.constant 0 : index
    %38 = vector.load %arg16[%c0_37, %c0_38] : memref<16x8xf32, #tpu.memory_space<vmem>>, vector<16x8xf32>
    tpu.vector_store %arg16[%c0_37, %c0_38], %37 {strides = array<i32>} : memref<16x8xf32, #tpu.memory_space<vmem>>, vector<16x8xf32>,
    return
  }
  func.func @transform_0(%arg0: i32) -> (i32, i32) {
    %c0_i32 = arith.constant 0 : i32
    %c0_i32_0 = arith.constant 0 : i32
    return %arg0, %c0_i32 : i32, i32
  }
  func.func @transform_1(%arg0: i32) -> (i32, i32) {
    %c0_i32 = arith.constant 0 : i32
    %c0_i32_0 = arith.constant 0 : i32
    return %arg0, %c0_i32 : i32, i32
  }
  func.func @transform_2(%arg0: i32) -> (i32, i32) {
    %c0_i32 = arith.constant 0 : i32
    %c0_i32_0 = arith.constant 0 : i32
    return %arg0, %c0_i32 : i32, i32
  }
  func.func @transform_3(%arg0: i32) -> (i32, i32) {
    %c0_i32 = arith.constant 0 : i32
    %c0_i32_0 = arith.constant 0 : i32
    return %arg0, %c0_i32 : i32, i32
  }
  func.func @transform_4(%arg0: i32) -> (i32, i32) {
    %c0_i32 = arith.constant 0 : i32
    %c0_i32_0 = arith.constant 0 : i32
    return %arg0, %c0_i32 : i32, i32
  }
  func.func @transform_5(%arg0: i32) -> (i32, i32) {
    %c0_i32 = arith.constant 0 : i32
    %c0_i32_0 = arith.constant 0 : i32
    %c0_i32_1 = arith.constant 0 : i32
    return %c0_i32, %c0_i32_0 : i32, i32
  }
  func.func @transform_6(%arg0: i32) -> (i32, i32) {
    %c0_i32 = arith.constant 0 : i32
    %c0_i32_0 = arith.constant 0 : i32
    %c0_i32_1 = arith.constant 0 : i32
    return %c0_i32, %c0_i32_0 : i32, i32
  }
  func.func @transform_7(%arg0: i32) -> (i32, i32) {
    %c0_i32 = arith.constant 0 : i32
    %c0_i32_0 = arith.constant 0 : i32
    %c0_i32_1 = arith.constant 0 : i32
    return %c0_i32, %c0_i32_0 : i32, i32
  }
  func.func @transform_8(%arg0: i32) -> (i32, i32) {
    %c0_i32 = arith.constant 0 : i32
    %c0_i32_0 = arith.constant 0 : i32
    %c0_i32_1 = arith.constant 0 : i32
    return %c0_i32, %c0_i32_0 : i32, i32
  }
  func.func @transform_9(%arg0: i32) -> (i32, i32) {
    %c0_i32 = arith.constant 0 : i32
    %c0_i32_0 = arith.constant 0 : i32
    %c0_i32_1 = arith.constant 0 : i32
    return %c0_i32, %c0_i32_0 : i32, i32
  }
  func.func @transform_10(%arg0: i32) -> (i32, i32) {
    %c0_i32 = arith.constant 0 : i32
    %c0_i32_0 = arith.constant 0 : i32
    %c0_i32_1 = arith.constant 0 : i32
    return %c0_i32, %c0_i32_0 : i32, i32
  }
  func.func @transform_11(%arg0: i32) -> (i32, i32) {
    %c0_i32 = arith.constant 0 : i32
    %c0_i32_0 = arith.constant 0 : i32
    %c0_i32_1 = arith.constant 0 : i32
    return %c0_i32, %c0_i32_0 : i32, i32
  }
  func.func @transform_12(%arg0: i32) -> (i32, i32) {
    %c0_i32 = arith.constant 0 : i32
    %c0_i32_0 = arith.constant 0 : i32
    %c0_i32_1 = arith.constant 0 : i32
    return %c0_i32, %c0_i32_0 : i32, i32
  }
  func.func @transform_13(%arg0: i32) -> (i32, i32) {
    %c0_i32 = arith.constant 0 : i32
    %c0_i32_0 = arith.constant 0 : i32
    %c0_i32_1 = arith.constant 0 : i32
    return %c0_i32, %c0_i32_0 : i32, i32
  }
  func.func @transform_14(%arg0: i32) -> (i32, i32) {
    %c0_i32 = arith.constant 0 : i32
    %c0_i32_0 = arith.constant 0 : i32
    %c0_i32_1 = arith.constant 0 : i32
    return %c0_i32, %c0_i32_0 : i32, i32
  }
  func.func @transform_15(%arg0: i32) -> (i32, i32) {
    %c0_i32 = arith.constant 0 : i32
    %c0_i32_0 = arith.constant 0 : i32
    return %arg0, %c0_i32 : i32, i32
  }
}

</mosaic_0001>

<bundles_post_ra>
// kernel: tpu_custom_call.1
= control target key start
LH: loop header
LB: loop body
LE: loop exit
PB: predicated region body
PF: predicated region fallthrough
CT: control target
= control target key end

     0   :  { %vm64_vm0 = vcmask 1040384   ;;  %vm99_vm1 = vcmask 1041408   ;;  %vm131_vm2 = vcmask 1043456   ;;  %vm60_vm3 = vcmask 15360   ;;  %s623_s5 = inlined_call_operand.vmem [shape: bf16[2,128], index: 5, kind: input, shape index: {}]   ;;  %s624_s6 = inlined_call_operand.vmem [shape: bf16[4,128], index: 6, kind: input, shape index: {}]   ;;  %s625_s7 = inlined_call_operand.vmem [shape: bf16[8,128], index: 7, kind: input, shape index: {}]   ;;  %s626_s0 = inlined_call_operand.vmem [shape: bf16[16,2], index: 0, kind: input, shape index: {}]   ;;  %s627_s1 = inlined_call_operand.vmem [shape: bf16[16,4], index: 1, kind: input, shape index: {}]   ;;  %s628_s8 = inlined_call_operand.vmem [shape: bf16[2,128], index: 8, kind: input, shape index: {}]   ;;  %s629_s2 = inlined_call_operand.vmem [shape: bf16[16,8], index: 2, kind: input, shape index: {}]   ;;  %s630_s9 = inlined_call_operand.vmem [shape: bf16[2,128], index: 9, kind: input, shape index: {}]   ;;  %s631_s10 = inlined_call_operand.vmem [shape: f32[1,128], index: 10, kind: input, shape index: {}]   ;;  %s632_s3 = inlined_call_operand.vmem [shape: bf16[16,2], index: 3, kind: input, shape index: {}]   ;;  %s633_s4 = inlined_call_operand.vmem [shape: bf16[16,2], index: 4, kind: input, shape index: {}]   ;;  %s634_s12 = inlined_call_operand.vmem [shape: f32[1,64], index: 12, kind: input, shape index: {}]   ;;  %s635_s11 = inlined_call_operand.vmem [shape: bf16[128,64], index: 11, kind: input, shape index: {}]   ;;  %s636_s13 = inlined_call_operand.vmem [shape: bf16[64,8], index: 13, kind: input, shape index: {}]   ;;  %s637_s14 = inlined_call_operand.vmem [shape: f32[1,8], index: 14, kind: input, shape index: {}]   ;;  %s638_s15 = inlined_call_operand.vmem [shape: f32[16,8], index: 15, kind: output, shape index: {}]  }
   0x1   :  { %v54_v0 = vld [vmem:[%s623_s5] sm:$0x1]  ;;  %vm95_vm4 = vcmask 31744   ;;  %vm127_vm5 = vcmask 64512   ;;  %v445_v15 = vld [vmem:[%s635_s11 + $0x38] sm:$0xff]  ;;  %v444_v16 = vld [vmem:[%s635_s11 + $0x30] sm:$0xff] }
   0x2   :  { %v89_v1 = vld [vmem:[%s624_s6] sm:$0x3]  ;;  %v66_v3 = vsel %vm64_vm0, %v54_v0, 0  ;;  %282 = vmatpush.bf16.msra.mxu1 %v445_v15  ;;  %v443_v17 = vld [vmem:[%s635_s11 + $0x28] sm:$0xff]  ;;  %v441_v19 = vld [vmem:[%s635_s11 + $0x18] sm:$0xff]  ;;  %vm335_vm6 = vcmask 523264  }
   0x3   :  { %v121_v2 = vld [vmem:[%s625_s7] sm:$0xf]  ;;  %v101_v4 = vsel %vm99_vm1, %v89_v1, 0  ;;  %75 = vmatpush.bf16.msra.mxu0 %v66_v3  ;;  %v440_v20 = vld [vmem:[%s635_s11 + $0x10] sm:$0xff]  ;;  %v439_v21 = vld [vmem:[%s635_s11 + $0x8] sm:$0xff] }
   0x4   :  { %v133_v5 = vsel %vm131_vm2, %v121_v2, 0  ;;  %v433_v6 = vld [vmem:[%s626_s0] sm:$0xff]  ;;  %110 = vmatpush.bf16.msra.mxu3 %v101_v4  ;;  %v449_v25 = vld [vmem:[%s636_s13 + $0x18] sm:$0xff]  ;;  %v448_v48 = vld [vmem:[%s636_s13 + $0x10] sm:$0xff] }
   0x5   :  { %v434_v7 = vld [vmem:[%s627_s1] sm:$0xff]  ;;  %142 = vmatpush.bf16.msra.mxu2 %v133_v5  ;;  %v447_v49 = vld [vmem:[%s636_s13 + $0x8] sm:$0xff] }
   0x6   :  { %v153_v8 = vld [vmem:[%s628_s8] sm:$0x1]  ;;  %363 = vmatmul.msk.bf16.vlgmr.msra.gmra.mxu0 %vm60_vm3, %v433_v6  ;;  %283 = vmatpush.bf16.msra.mxu1 %v444_v16 }
   0x7   :  { %v435_v9 = vld [vmem:[%s629_s2] sm:$0xff]  ;;  %v163_v11 = vsel %vm64_vm0, %v153_v8, 0  ;;  %368 = vmatmul.msk.bf16.vlgmr.msra.gmra.mxu3 %vm95_vm4, %v434_v7 }
   0x8   :  { %v183_v10 = vld [vmem:[%s630_s9] sm:$0x1]  ;;  %172 = vmatpush.bf16.msrb.mxu3 %v163_v11  ;;  %373 = vmatmul.msk.bf16.vlgmr.msra.gmra.mxu2 %vm127_vm5, %v435_v9 }
   0x9   :  { %v193_v12 = vsel %vm64_vm0, %v183_v10, 0  ;;  %v436_v13 = vld [vmem:[%s632_s3] sm:$0xff]  ;;  %343 = vmatpush.bf16.msrb.mxu2 %v449_v25 }
   0xa   :  { %202 = vmatpush.bf16.msrb.mxu0 %v193_v12  ;;  %v437_v14 = vld [vmem:[%s633_s4] sm:$0xff]  ;;  %284 = vmatpush.bf16.msra.mxu1 %v443_v17 }
   0xb   :  { %v442_v18 = vld [vmem:[%s635_s11 + $0x20] sm:$0xff] }
   0xc   :  { %v438_v23 = vld [vmem:[%s635_s11] sm:$0xff] }
   0xd   :  { %v450_v27 = vld [vmem:[%s631_s10] ss:$0 sm:$0xff]  ;;  %344 = vmatpush.bf16.msrb.mxu2 %v448_v48 }
   0xe   :  { %285 = vmatpush.bf16.msra.mxu1 %v442_v18  ;;  %v446_v50 = vld [vmem:[%s636_s13] sm:$0xff] }
   0xf   :  { %v451_v52 = vld [vmem:[%s634_s12] ss:$0 sm:$0xff] }
  0x10   :  { %v452_v59 = vld [vmem:[%s637_s14] ss:$0 sm:$0xff] }
  0x11   :  { %345 = vmatpush.bf16.msrb.mxu2 %v447_v49 }
  0x12   :  { %286 = vmatpush.bf16.msra.mxu1 %v441_v19 }
  0x15   :  { %346 = vmatpush.bf16.msrb.mxu2 %v446_v50 }
  0x16   :  { %383 = vmatmul.msk.bf16.vlgmr.msrb.gmra.mxu0 %vm60_vm3, %v437_v14  ;;  %287 = vmatpush.bf16.msra.mxu1 %v440_v20 }
  0x17   :  { %378 = vmatmul.msk.bf16.vlgmr.msrb.gmra.mxu3 %vm60_vm3, %v436_v13 }
  0x1a   :  { %288 = vmatpush.bf16.msra.mxu1 %v439_v21 }
  0x1e   :  { %289 = vmatpush.bf16.msra.mxu1 %v438_v23 }
  0x83   :  { %v77_v22 = vpop.f32.mrf.mxu0 }
  0x84   :  { %v85_v30 = vadd.f32 %v450_v27, %v77_v22 }
  0x8a   :  { %v112_v24 = vpop.f32.mrf.mxu3 }
  0x8b   :  { %v79_v26 = vpop.f32.mrf.mxu0  ;;  %v144_v29 = vpop.f32.mrf.mxu2  ;;  %v117_v31 = vadd.f32 %v112_v24, %v85_v30 }
  0x8c   :  { %v86_v34 = vadd.f32 %v450_v27, %v79_v26 }
  0x8d   :  { %v149_v35 = vadd.f32 %v144_v29, %v117_v31 }
  0x92   :  { %v114_v28 = vpop.f32.mrf.mxu3 }
  0x93   :  { %v204_v32 = vpop.f32.mrf.mxu0  ;;  %v118_v36 = vadd.f32 %v114_v28, %v86_v34  ;;  %v146_v37 = vpop.f32.mrf.mxu2 }
  0x95   :  { %v150_v39 = vadd.f32 %v146_v37, %v118_v36 }
  0x9a   :  { %v174_v33 = vpop.f32.mrf.mxu3 }
  0x9b   :  { %v179_v38 = vadd.f32 %v174_v33, %v149_v35  ;;  %v206_v43 = vpop.f32.mrf.mxu0 }
  0x9d   :  { %v209_v41 = vadd.f32 %v204_v32, %v179_v38 }
  0x9f   :  { %v211_v45 = vmax.f32 %v209_v41, 0.0 }
  0xa2   :  { %v176_v40 = vpop.f32.mrf.mxu3 }
  0xa3   :  { %v180_v42 = vadd.f32 %v176_v40, %v150_v39 }
  0xa5   :  { %v210_v44 = vadd.f32 %v206_v43, %v180_v42 }
  0xa7   :  { %v212_v46 = vmax.f32 %v210_v44, 0.0 }
  0xa9   :  { %v213_v47 = vpack.c.bf16 %v212_v46, %v211_v45 }
  0xab   :  { %290 = vmatmul.bf16.vlgmr.msra.gmra.mxu1 %v213_v47 }
 0x128   :  { %v291_v51 = vpop.f32.mrf.mxu1 }
 0x129   :  { %v292_v53 = vadd.f32 %v451_v52, %v291_v51 }
 0x12b   :  { %v296_v56 = vmax.f32 %v292_v53, 0.0 }
 0x130   :  { %v293_v54 = vpop.f32.mrf.mxu1 }
 0x131   :  { %v294_v55 = vadd.f32 %v451_v52, %v293_v54 }
 0x133   :  { %v297_v57 = vmax.f32 %v294_v55, 0.0 }
 0x135   :  { %v298_v58 = vpack.c.bf16 %v297_v57, %v296_v56 }
 0x137   :  { %432 = vmatmul.msk.bf16.vlgmr.msrb.gmra.mxu2 %vm335_vm6, %v298_v58 }
 0x1ba   :  { %v348_v60 = vpop.f32.mrf.mxu2 }
 0x1bb   :  { %v349_v61 = vadd.f32 %v452_v59, %v348_v60 }
 0x1bd   :  { %353 = vst.msk [vmem:[%s638_s15] sm:$0xff] %vm127_vm5, %v349_v61 }
 0x1c2   :  { %v350_v62 = vpop.f32.mrf.mxu2 }
 0x1c3   :  { %v351_v63 = vadd.f32 %v452_v59, %v350_v62 }
 0x1c5   :  { %354 = vst.msk [vmem:[%s638_s15 + $0x8] sm:$0xff] %vm127_vm5, %v351_v63 }

</bundles_post_ra>
